<compile_context>
chip_gen: v7x
topology: tpu7x:2x2x1
jax: 0.10.0
libtpu: 0.0.40
codegen_flags: <defaults>
</compile_context>

<pallas_src>
import functools
import math

import jax
import jax.numpy as jnp
import numpy as np
from jax import lax
from jax.experimental import pallas as pl
from jax.experimental.pallas import tpu as pltpu


def _conv_prelu_kernel(alpha_ref, w_ref, b_ref, p_ref, o_ref, *, width, k):
    """One grid step: o = PReLU(sum_kw W[kw] @ shift_kw(P) + b).

    alpha_ref : SMEM (1,)                 shared PReLU slope
    w_ref     : VMEM (K, Cout, K*Cin)     one (Cout, K*Cin) weight slab per kw tap
    b_ref     : VMEM (Cout, 1)            bias (broadcasts over the lane axis)
    p_ref     : VMEM (K*Cin, TS)          kh-only im2col patches for this tile
    o_ref     : VMEM (Cout, TS)           output tile; lane axis = flat spatial
    """
    p = p_ref[...]
    kkc, ts = p.shape
    # Image column of every lane.  Tiles always start at w == 0 (TS is a
    # multiple of W, or the tile is a whole padded image), so lane % W is the
    # true column for all valid lanes.
    col = lax.broadcasted_iota(jnp.int32, (kkc, ts), 1) % width

    half = k // 2
    dims = (((1,), (0,)), ((), ()))
    acc = None
    for kw in range(k):
        off = kw - half                       # input column = output column + off
        if off == 0:
            tap = p
        else:
            # roll(x, shift=t): out[i] = x[i - t]; we need out[i] = p[i + off].
            shifted = pltpu.roll(p, shift=(-off) % ts, axis=1)
            if off < 0:                       # left taps: zero at left image edge
                tap = jnp.where(col >= -off, shifted, jnp.zeros_like(shifted))
            else:                             # right taps: zero at right image edge
                tap = jnp.where(col < width - off, shifted, jnp.zeros_like(shifted))
        d = lax.dot_general(w_ref[kw], tap, dims,
                            preferred_element_type=jnp.float32)
        acc = d if acc is None else acc + d

    acc = acc + b_ref[...]                    # (Cout, 1) broadcast, f32
    alpha = alpha_ref[0]
    out = jnp.where(acc >= 0, acc, alpha * acc)   # PReLU (shared slope)
    o_ref[...] = out.astype(o_ref.dtype)


def _round_up(x, m):
    return ((x + m - 1) // m) * m


def _vmem_limit_bytes():
    """Generation-aware VMEM claim (v5e/v6e: 128 MiB physical, v7x: 64 MiB/TC)."""
    try:
        phys = pltpu.get_tpu_info().vmem_capacity_bytes
    except Exception:
        phys = 64 * 1024 * 1024   # conservative fallback = smallest (v7x per-TC)
    return int(phys * 0.70)


def _pick_spatial_tile(hw, width, kkc, cout, k, in_item, out_item, vmem_limit):
    """Spatial (lane) tile size: multiple of 128 (lane-dense) and of W (so every
    tile starts at column 0, making the in-kernel kw rolls/masks exact), unless a
    single padded image fits in one tile.  Sized so double-buffered patches +
    output blocks plus weights fit the generation's VMEM budget."""
    base = 128 * width // math.gcd(128, width)
    hw128 = _round_up(hw, 128)
    if base >= hw128:
        return hw128                          # one (padded) image per tile
    fixed = 2 * (k * cout * kkc * in_item + cout * 4)          # weights + bias
    per_lane = 2 * (kkc * in_item + cout * out_item)           # dbl-buffered blocks
    cap = (int(vmem_limit * 0.6) - fixed) // max(per_lane, 1)
    ts = min(_round_up(hw, base), max(base, (cap // base) * base))
    return ts


def conv_block(x_nchw, weight, bias, alpha, *, compute_dtype=None):
    """ConvBlock forward (norm=None path): PReLU(Conv2d(x)), stride=1, pad=K//2.

    x_nchw : (N, Cin, H, W)
    weight : (Cout, Cin, K, K)   PyTorch Conv2d layout (K odd)
    bias   : (Cout,)
    alpha  : scalar PReLU slope (nn.PReLU() default: num_parameters=1)
    compute_dtype : optional matmul-operand dtype.  jnp.bfloat16 halves the
        mem-bound patches stream on v5e/v6e/v7x (the MXU consumes bf16 natively
        on all three); accumulation and the bias/PReLU epilogue stay float32.
    """
    N, Cin, H, W = x_nchw.shape
    Cout, _, K, Kw = weight.shape
    assert K == Kw and K % 2 == 1, "square odd kernel expected"
    pad = K // 2
    HW = H * W
    KKC = K * Cin

    mm_dtype = x_nchw.dtype if compute_dtype is None else compute_dtype
    out_dtype = x_nchw.dtype          # TODO(synk): allow bf16 output when the net is bf16
    in_item = jnp.dtype(mm_dtype).itemsize
    out_item = jnp.dtype(out_dtype).itemsize

    vmem_limit = _vmem_limit_bytes()
    TS = _pick_spatial_tile(HW, W, KKC, Cout, K, in_item, out_item, vmem_limit)
    HWpad = _round_up(HW, TS)
    n_s = HWpad // TS

    # ---- wrapper glue (XLA): kh-only im2col (K x blow-up instead of K^2 x),
    # zero-padded in H, flat spatial axis padded to a multiple of TS.
    x_padh = jnp.pad(x_nchw, ((0, 0), (0, 0), (pad, pad), (0, 0)))
    taps = [x_padh[:, :, kh:kh + H, :] for kh in range(K)]      # (N, Cin, H, W) each
    patches = jnp.stack(taps, axis=1).reshape(N, KKC, HW)
    if HWpad != HW:
        patches = jnp.pad(patches, ((0, 0), (0, 0), (0, HWpad - HW)))
    patches = patches.astype(mm_dtype)

    # weight (Cout, Cin, Kh, Kw) -> (Kw, Cout, Kh, Cin) -> (Kw, Cout, Kh*Cin),
    # matching the kh-major / channel-minor patch rows and the per-kw dots.
    w3 = jnp.transpose(weight, (3, 0, 2, 1)).reshape(K, Cout, KKC).astype(mm_dtype)
    b2 = bias.reshape(Cout, 1).astype(jnp.float32)
    a = jnp.asarray(alpha, jnp.float32).reshape(1)

    # Grid-constant operands: single-buffer them once they are big enough for the
    # saved VMEM to matter (tiny weights keep the default pipelining).
    if K * Cout * KKC * in_item > (1 << 21):
        w_spec = pl.BlockSpec((K, Cout, KKC), lambda n, s: (0, 0, 0),
                              pipeline_mode=pl.Buffered(1))
        b_spec = pl.BlockSpec((Cout, 1), lambda n, s: (0, 0),
                              pipeline_mode=pl.Buffered(1))
    else:
        w_spec = pl.BlockSpec((K, Cout, KKC), lambda n, s: (0, 0, 0))
        b_spec = pl.BlockSpec((Cout, 1), lambda n, s: (0, 0))

    cost = pl.CostEstimate(
        flops=2 * N * Cout * K * K * Cin * HW,
        transcendentals=0,
        bytes_accessed=(patches.size * in_item + w3.size * in_item
                        + b2.size * 4 + a.size * 4
                        + N * Cout * HWpad * out_item))

    kernel = functools.partial(_conv_prelu_kernel, width=W, k=K)
    out_flat = pl.pallas_call(
        kernel,
        out_shape=jax.ShapeDtypeStruct((N, Cout, HWpad), out_dtype),
        grid=(N, n_s),
        in_specs=[
            pl.BlockSpec(memory_space=pltpu.MemorySpace.SMEM),       # alpha
            w_spec,                                                  # weights
            b_spec,                                                  # bias
            pl.BlockSpec((None, KKC, TS), lambda n, s: (n, 0, s)),   # patches
        ],
        out_specs=pl.BlockSpec((None, Cout, TS), lambda n, s: (n, 0, s)),
        compiler_params=pltpu.CompilerParams(
            dimension_semantics=("parallel", "parallel"),
            vmem_limit_bytes=vmem_limit),
        cost_estimate=cost,
    )(a, w3, b2, patches)

    if HWpad != HW:
        out_flat = out_flat[:, :, :HW]
    return out_flat.reshape(N, Cout, H, W)


def _reference(x_nchw, weight, bias, alpha):
    """Pure-JAX reference: lax conv + bias + PReLU."""
    out = lax.conv_general_dilated(
        x_nchw, weight, window_strides=(1, 1), padding="SAME",
        dimension_numbers=("NCHW", "OIHW", "NCHW"))
    out = out + bias.reshape(1, -1, 1, 1)
    return jnp.where(out >= 0, out, alpha * out)


if __name__ == "__main__":
    key = jax.random.PRNGKey(0)
    kx, kw_, kb, kx2 = jax.random.split(key, 4)

    N, Cin, Cout, H, W, K = 2, 4, 8, 16, 16, 3
    x = jax.random.normal(kx, (N, Cin, H, W), jnp.float32)
    s = 1.0 / np.sqrt(Cin * K * K)     # PyTorch Conv2d U(-s, s) init scale
    weight = jax.random.uniform(kw_, (Cout, Cin, K, K), jnp.float32, -s, s)
    bias = jax.random.uniform(kb, (Cout,), jnp.float32, -s, s)
    alpha = 0.25                        # PReLU default init

    ref = _reference(x, weight, bias, alpha)

    # float32 path (matches the reference module's precision)
    out = jax.block_until_ready(conv_block(x, weight, bias, alpha))
    np.testing.assert_allclose(np.asarray(out), np.asarray(ref), rtol=1e-2, atol=1e-2)

    # bf16 matmul-operand path (mem-bound win on v5e/v6e/v7x; f32 accum/epilogue)
    out_bf16 = jax.block_until_ready(
        conv_block(x, weight, bias, alpha, compute_dtype=jnp.bfloat16))
    np.testing.assert_allclose(np.asarray(out_bf16), np.asarray(ref), rtol=5e-2, atol=5e-2)

    # Awkward spatial size (H=W=14 -> HW=196): exercises the pad-to-128 tile path.
    x2 = jax.random.normal(kx2, (N, Cin, 14, 14), jnp.float32)
    ref2 = _reference(x2, weight, bias, alpha)
    out2 = jax.block_until_ready(conv_block(x2, weight, bias, alpha))
    np.testing.assert_allclose(np.asarray(out2), np.asarray(ref2), rtol=1e-2, atol=1e-2)

    print("KERNEL_OK")
</pallas_src>

<mosaic_0001>
module attributes {stable_mosaic.version = 11 : i64} {
  func.func @_conv_prelu_kernel(%arg0: i32, %arg1: i32, %arg2: memref<1xf32, #tpu.memory_space<smem>>, %arg3: memref<3x8x12xf32, #tpu.memory_space<vmem>>, %arg4: memref<8x1xf32, #tpu.memory_space<vmem>>, %arg5: memref<1x12x256xf32, #tpu.memory_space<vmem>>, %arg6: memref<1x8x256xf32, #tpu.memory_space<vmem>>) attributes {dimension_semantics = [#tpu.dimension_semantics<parallel>, #tpu.dimension_semantics<parallel>], iteration_bounds = array<i64: 2, 1>, scalar_prefetch = 0 : i64, scratch_operands = 0 : i64, tpu.core_type = #tpu.core_type<tc>, window_params = [{transform_indices = @transform_0, window_bounds = array<i64: 1>}, {pipeline_mode = #tpu.pipeline_mode<synchronous>, transform_indices = @transform_1, window_bounds = array<i64: 3, 8, 12>}, {pipeline_mode = #tpu.pipeline_mode<synchronous>, transform_indices = @transform_2, window_bounds = array<i64: 8, 1>}, {transform_indices = @transform_3, window_bounds = array<i64: 1, 12, 256>}, {transform_indices = @transform_4, window_bounds = array<i64: 1, 8, 256>}]} {
    %c0 = arith.constant 0 : index
    %c0_0 = arith.constant 0 : index
    %c0_1 = arith.constant 0 : index
    %0 = vector.load %arg5[%c0, %c0_0, %c0_1] : memref<1x12x256xf32, #tpu.memory_space<vmem>>, vector<1x12x256xf32>
    %1 = vector.shape_cast %0 : vector<1x12x256xf32> to vector<12x256xf32>
    %2 = tpu.iota {dimensions = array<i32: 1>} : vector<12x256xi32>
    %c16_i32 = arith.constant 16 : i32
    %c0_i32 = arith.constant 0 : i32
    %3 = arith.cmpi eq, %c16_i32, %c0_i32 : i32
    %c1_i32 = arith.constant 1 : i32
    %4 = arith.select %3, %c1_i32, %c16_i32 : i32
    %5 = vector.broadcast %4 : i32 to vector<12x256xi32>
    %6 = arith.remsi %2, %5 : vector<12x256xi32>
    %c0_i32_2 = arith.constant 0 : i32
    %7 = vector.broadcast %c0_i32_2 : i32 to vector<12x256xi32>
    %8 = arith.cmpi ne, %6, %7 : vector<12x256xi32>
    %c0_i32_3 = arith.constant 0 : i32
    %9 = vector.broadcast %c0_i32_3 : i32 to vector<12x256xi32>
    %10 = arith.cmpi slt, %6, %9 : vector<12x256xi32>
    %c0_i32_4 = arith.constant 0 : i32
    %11 = arith.cmpi slt, %4, %c0_i32_4 : i32
    %12 = vector.broadcast %11 : i1 to vector<12x256xi1>
    %13 = vector.broadcast %12 : vector<12x256xi1> to vector<12x256xi1>
    %14 = arith.xori %10, %13 : vector<12x256xi1>
    %15 = arith.andi %14, %8 : vector<12x256xi1>
    %16 = vector.broadcast %4 : i32 to vector<12x256xi32>
    %17 = arith.addi %6, %16 : vector<12x256xi32>
    %18 = arith.select %15, %17, %6 : vector<12x256xi1>, vector<12x256xi32>
    %c1_i32_5 = arith.constant 1 : i32
    %19 = tpu.dynamic_rotate %1 by %c1_i32_5 dim 1 : vector<12x256xf32>, i32 -> vector<12x256xf32>
    %c1_i32_6 = arith.constant 1 : i32
    %20 = vector.broadcast %c1_i32_6 : i32 to vector<12x256xi32>
    %21 = arith.cmpi sge, %18, %20 : vector<12x256xi32>
    %cst = arith.constant 0.000000e+00 : f32
    %22 = vector.broadcast %cst : f32 to vector<12x256xf32>
    %23 = arith.select %21, %19, %22 : vector<12x256xi1>, vector<12x256xf32>
    %c0_7 = arith.constant 0 : index
    %c0_8 = arith.constant 0 : index
    %c0_9 = arith.constant 0 : index
    %24 = vector.load %arg3[%c0_7, %c0_8, %c0_9] : memref<3x8x12xf32, #tpu.memory_space<vmem>>, vector<1x8x12xf32>
    %25 = vector.shape_cast %24 : vector<1x8x12xf32> to vector<8x12xf32>
    %cst_10 = arith.constant dense<0.000000e+00> : vector<8x256xf32>
    %26 = tpu.matmul %25, %23, %cst_10 {dimension_numbers = #tpu.dot_dimension_numbers<[1], [0], [0], [1], [0, 0, 1, 1], [], []>} : vector<8x12xf32>, vector<12x256xf32>, vector<8x256xf32> -> vector<8x256xf32>
    %c1 = arith.constant 1 : index
    %c0_11 = arith.constant 0 : index
    %c0_12 = arith.constant 0 : index
    %27 = vector.load %arg3[%c1, %c0_11, %c0_12] : memref<3x8x12xf32, #tpu.memory_space<vmem>>, vector<1x8x12xf32>
    %28 = vector.shape_cast %27 : vector<1x8x12xf32> to vector<8x12xf32>
    %cst_13 = arith.constant dense<0.000000e+00> : vector<8x256xf32>
    %29 = tpu.matmul %28, %1, %cst_13 {dimension_numbers = #tpu.dot_dimension_numbers<[1], [0], [0], [1], [0, 0, 1, 1], [], []>} : vector<8x12xf32>, vector<12x256xf32>, vector<8x256xf32> -> vector<8x256xf32>
    %30 = arith.addf %26, %29 : vector<8x256xf32>
    %c255_i32 = arith.constant 255 : i32
    %31 = tpu.dynamic_rotate %1 by %c255_i32 dim 1 : vector<12x256xf32>, i32 -> vector<12x256xf32>
    %c15_i32 = arith.constant 15 : i32
    %32 = vector.broadcast %c15_i32 : i32 to vector<12x256xi32>
    %33 = arith.cmpi slt, %18, %32 : vector<12x256xi32>
    %cst_14 = arith.constant 0.000000e+00 : f32
    %34 = vector.broadcast %cst_14 : f32 to vector<12x256xf32>
    %35 = arith.select %33, %31, %34 : vector<12x256xi1>, vector<12x256xf32>
    %c2 = arith.constant 2 : index
    %c0_15 = arith.constant 0 : index
    %c0_16 = arith.constant 0 : index
    %36 = vector.load %arg3[%c2, %c0_15, %c0_16] : memref<3x8x12xf32, #tpu.memory_space<vmem>>, vector<1x8x12xf32>
    %37 = vector.shape_cast %36 : vector<1x8x12xf32> to vector<8x12xf32>
    %cst_17 = arith.constant dense<0.000000e+00> : vector<8x256xf32>
    %38 = tpu.matmul %37, %35, %cst_17 {dimension_numbers = #tpu.dot_dimension_numbers<[1], [0], [0], [1], [0, 0, 1, 1], [], []>} : vector<8x12xf32>, vector<12x256xf32>, vector<8x256xf32> -> vector<8x256xf32>
    %39 = arith.addf %30, %38 : vector<8x256xf32>
    %c0_18 = arith.constant 0 : index
    %c0_19 = arith.constant 0 : index
    %40 = vector.load %arg4[%c0_18, %c0_19] : memref<8x1xf32, #tpu.memory_space<vmem>>, vector<8x1xf32>
    %41 = vector.broadcast %40 : vector<8x1xf32> to vector<8x256xf32>
    %42 = arith.addf %39, %41 : vector<8x256xf32>
    %c0_20 = arith.constant 0 : index
    %43 = memref.load %arg2[%c0_20] : memref<1xf32, #tpu.memory_space<smem>>
    %cst_21 = arith.constant 0.000000e+00 : f32
    %44 = vector.broadcast %cst_21 : f32 to vector<8x256xf32>
    %45 = arith.cmpf oge, %42, %44 : vector<8x256xf32>
    %46 = vector.broadcast %43 : f32 to vector<8x256xf32>
    %47 = arith.mulf %46, %42 : vector<8x256xf32>
    %48 = arith.select %45, %42, %47 : vector<8x256xi1>, vector<8x256xf32>
    %c0_22 = arith.constant 0 : index
    %c0_23 = arith.constant 0 : index
    %c0_24 = arith.constant 0 : index
    %49 = vector.load %arg6[%c0_22, %c0_23, %c0_24] : memref<1x8x256xf32, #tpu.memory_space<vmem>>, vector<1x8x256xf32>
    %50 = vector.shape_cast %49 : vector<1x8x256xf32> to vector<8x256xf32>
    %51 = vector.shape_cast %48 : vector<8x256xf32> to vector<1x8x256xf32>
    tpu.vector_store %arg6[%c0_22, %c0_23, %c0_24], %51 {strides = array<i32>} : memref<1x8x256xf32, #tpu.memory_space<vmem>>, vector<1x8x256xf32>,
    return
  }
  func.func @transform_0(%arg0: i32, %arg1: i32) -> i32 {
    %c0_i32 = arith.constant 0 : i32
    %c0_i32_0 = arith.constant 0 : i32
    return %c0_i32 : i32
  }
  func.func @transform_1(%arg0: i32, %arg1: i32) -> (i32, i32, i32) {
    %c0_i32 = arith.constant 0 : i32
    %c0_i32_0 = arith.constant 0 : i32
    %c0_i32_1 = arith.constant 0 : i32
    %c0_i32_2 = arith.constant 0 : i32
    return %c0_i32, %c0_i32_0, %c0_i32_1 : i32, i32, i32
  }
  func.func @transform_2(%arg0: i32, %arg1: i32) -> (i32, i32) {
    %c0_i32 = arith.constant 0 : i32
    %c0_i32_0 = arith.constant 0 : i32
    %c0_i32_1 = arith.constant 0 : i32
    return %c0_i32, %c0_i32_0 : i32, i32
  }
  func.func @transform_3(%arg0: i32, %arg1: i32) -> (i32, i32, i32) {
    %c0_i32 = arith.constant 0 : i32
    %c0_i32_0 = arith.constant 0 : i32
    return %arg0, %c0_i32, %arg1 : i32, i32, i32
  }
  func.func @transform_4(%arg0: i32, %arg1: i32) -> (i32, i32, i32) {
    %c0_i32 = arith.constant 0 : i32
    %c0_i32_0 = arith.constant 0 : i32
    return %arg0, %c0_i32, %arg1 : i32, i32, i32
  }
}

</mosaic_0001>

<bundles_post_ra>
// kernel: tpu_custom_call.1
= control target key start
LH: loop header
LB: loop body
LE: loop exit
PB: predicated region body
PF: predicated region fallthrough
CT: control target
= control target key end

     0   :  { %s1079_s0 = inlined_call_operand.<no memory space> [shape: f32[1], index: 0, kind: input, shape index: {}]   ;;  %s1080_s1 = inlined_call_operand.vmem [shape: f32[3,8,12], index: 1, kind: input, shape index: {}]   ;;  %s1081_s2 = inlined_call_operand.vmem [shape: f32[8,1], index: 2, kind: input, shape index: {}]   ;;  %s1082_s3 = inlined_call_operand.vmem [shape: f32[2,12,256], index: 3, kind: input, shape index: {}]   ;;  %s1083_s4 = inlined_call_operand.hbm [shape: f32[2,8,256], index: 4, kind: output, shape index: {}]  }
   0x1   :  { %9 = sst [smem:[#allocation2]] %s1079_s0 }
   0x2   :  { %10 = vsyncpa [#allocation4], 0 }
   0x3   :  { %12 = vsyncpa [#allocation4 + $0x1], 0  ;;  %s904_s17 = smov 0   ;;  %s906_s18 = smov 0  }
   0x4   :  { %s908_s19 = smov 0   ;;  %s910_s20 = smov 0  }
   0x5   :  { %s912_s21 = smov 0   ;;  %s914_s22 = smov 0  }
   0x6 LB: > { %s657_s0 = sadd.s32 4294967295, %s868_s22   ;;  %s658_s23 = sadd.s32 4294967294, %s868_s22   ;;  %s868_s22 = sphi %s914_s22, %s18_s22   ;;  %s864_s21 = sphi %s912_s21, %s1098_s21   ;;  %s860_s20 = sphi %s910_s20, %s1097_s20   ;;  %s856_s19 = sphi %s908_s19, %s1096_s19   ;;  %s852_s18 = sphi %s906_s18, %s1095_s18   ;;  %s848_s17 = sphi %s904_s17, %s1094_s17  }
   0x7   : > { %s30_s24 = sadd.s32 1, %s864_s21  ;;  %s130_s25 = sadd.s32 1, %s856_s19 }
   0x8   : > { %p32_p0 = scmp.ge.s32.totalorder %s30_s24, 2  ;;  %p140_p1 = scmp.ne.s32.totalorder %s856_s19, %s852_s18 }
   0x9   : > { %p141_p2 = scmp.eq.s32.totalorder %s657_s0, 1  ;;  %p146_p3 = scmp.ne.s32.totalorder %s852_s18, %s848_s17 }
   0xa   : > { %s1100_s24 = smov (%p32_p0, %s30_s24), 0  ;;  %p147_p5 = scmp.eq.s32.totalorder %s658_s23, 1 }
   0xb   : > { %p944_p4 = por %p141_p2, %p140_p1  ;;  %s125_s27 = ssub.s32 %s864_s21, %s1100_s24 }
   0xc   : > { %p661_p6 = scmp.ge.s32.totalorder %s868_s22, 1  ;;  %p128_p7 = scmp.eq.s32.totalorder %s125_s27, 0 }
   0xd   : > { %p951_p8 = por %p147_p5, %p146_p3  ;;  %p187_p9 = scmp.lt.s32.totalorder %s868_s22, 3 }
   0xe   : > { %s957_s29 = scalar_select %p128_p7, %s856_s19, %s130_s25  }
   0xf   : > { %p188_p10 = pnand %p661_p6, %p187_p9 }
  0x10   : > { %p218_p11 = scmp.lt.s32.totalorder (!%p188_p10), %s860_s20, 1  ;;  %s870_s9 = smov (!%p188_p10), 1   ;;  %v872_v6 = vmov (!%p188_p10), 0.0   ;;  %vm285_vm0 = vcmask (!%p188_p10), 1043456   ;;  %vm873_vm1 = vmmov (!%p188_p10), 1   ;;  %v665_v9 = vld [vmem:[%s1080_s1 + $0x8] sm:$0xff] (!%p188_p10)  ;;  %v232_v12 = vlaneseq (!%p188_p10) }
  0x11   : > { %191 = sbr.rel (%p188_p10) target bundleno = 401 (0x191), region = 36  ;;  %s871_s10 = smov (!%p188_p10), 127   ;;  %436 = vmatprep.mubr.f32.mxu0 (!%p188_p10), %v872_v6  ;;  %356 = vmatprep.mubr.f32.mxu1 (!%p188_p10), %v872_v6  ;;  %vm688_vm2 = vmpackc.low (!%p188_p10), %vm285_vm0, %vm873_vm1  ;;  %vm281_vm3 = vcmask (!%p188_p10), 97280   ;;  %v546_v10 = vld [vmem:[%s1081_s2] sm:$0xff] (!%p188_p10)  ;;  %v874_v11 = vmov (!%p188_p10), 0   ;;  %v674_v50 = vld [vmem:[%s1080_s1 + $0x10] sm:$0xff] (!%p188_p10) }
  0x12   : > { %789 = vset.pattern.permute.xlu0 (!%p188_p10), %v874_v11  ;;  %v233_v13 = vand.u32 (!%p188_p10), 127, %v232_v12  ;;  %v278_v49 = vld [vmem:[%s1080_s1] sm:$0xff] (!%p188_p10)  ;;  %s554_s25 = sld [smem:[#allocation2]] (!%p188_p10)  ;;  %s214_s27 = sand.u32 (!%p188_p10), 1, %s852_s18  }
  0x13   : > { %s875_s12 = smov (!%p188_p10), [#allocation3]  }
  0x14   : > { %v234_v14 = vadd.s32 (!%p188_p10), 128, %v233_v13  ;;  %v239_v16 = vand.u32 (!%p188_p10), 15, %v233_v13  ;;  %vm451_vm4 = vcmp.lt.s32.totalorder (!%p188_p10), %v233_v13, 127  ;;  %vm267_vm5 = vcmp.lt.s32.totalorder (!%p188_p10), %v233_v13, 1  ;;  %s794_s13 = sshll.u32 (!%p188_p10), %s875_s12, 4  ;;  %s795_s13 = int_to_ptr.vmem [resolvable:$false] %s794_s13 }
  0x15   : > { %s796_s14 = scalar_lea.vmem (!%p188_p10), %s795_s13, 512 }
  0x16   : > { %v246_v15 = vand.u32 (!%p188_p10), 15, %v234_v14  ;;  %vm978_vm7 = vcmp.ge.s32.totalorder (!%p188_p10), %v239_v16, 1  ;;  %vm990_vm9 = vcmp.lt.s32.totalorder (!%p188_p10), %v239_v16, 15 }
  0x17   : > { %vm697_vm11 = vmpackc.low (!%p188_p10), %vm285_vm0, %vm978_vm7 }
  0x18   : > { %s219_s30 = scalar_select %p218_p11, %s860_s20, 1  ;;  %vm974_vm6 = vcmp.lt.s32.totalorder %v246_v15, 15  ;;  %vm984_vm8 = vcmp.ge.s32.totalorder %v246_v15, 1  ;;  %vm703_vm13 = vmpackc.low %vm285_vm0, %vm990_vm9  ;;  %v557_v58 = vstv %s554_s25 }
  0x19   : > { %vm694_vm10 = vmpackc.low %vm285_vm0, %vm984_vm8 }
  0x1a   : > { %s685_s5 = sshll.u32 %s219_s30, 5  ;;  %vm700_vm12 = vmpackc.low %vm285_vm0, %vm974_vm6  ;;  %s662_s30 = sshll.u32 %s214_s27, 4 }
  0x1b   : > { %s225_s8 = scalar_lea.vmem %s1082_s3, %s685_s5  ;;  %s686_s5 = sshll.u32 %s860_s20, 8 }
  0x1c   : > { %v230_v0 = vld [vmem:[%s225_s8 + $0x10] sm:$0xf]  ;;  %v231_v1 = vld [vmem:[%s225_s8 + $0x18] sm:$0xf]  ;;  %v228_v2 = vld [vmem:[%s225_s8] sm:$0xff]  ;;  %s216_s6 = scalar_lea.vmem [#allocation3], %s662_s30 }
  0x1d   : > { %v769_v3 = vpack.i.bf16 %v231_v1, %v230_v0  ;;  %v229_v4 = vld [vmem:[%s225_s8 + $0x8] sm:$0xff]  ;;  %v690_v8 = vpack.c.bf16 %v230_v0, %v228_v2  ;;  %s581_s7 = sshll.u32 %s216_s6, 4  ;;  %s565_s20 = scalar_lea.sflag [#allocation4], %s214_s27  ;;  %s1034_s7 = int_to_ptr.vmem [resolvable:$true] %s581_s7 }
  0x1e   : > { %v774_v5 = vpack.i.bf16 %v229_v4, %v228_v2  ;;  %v687_v7 = vpack.c.bf16 %v231_v1, %v229_v4  ;;  %s790_s11 = scalar_lea.vmem %s1034_s7, 256  ;;  %p797_p1 = scmp.lt.s32.totalorder %s1034_s7, %s795_s13 }
  0x1f   : > { %770 = vrot.lane.b32.xlu0 %v769_v3, %s870_s9  ;;  %780 = vrot.lane.b32.xlu1 %v769_v3, %s871_s10  ;;  %p791_p12 = scmp.ne.s32.totalorder %s1034_s7, %s790_s11  ;;  %p798_p2 = scmp.lt.s32.totalorder %s796_s14, %s790_s11 }
  0x20   : > { %689 = vmatprep.subr.msk.bf16.mxu1 %vm688_vm2, %v687_v7 }
  0x21   : > { %692 = vmatpush1.bf16.msk.msra.mxu1 %vm688_vm2, %v690_v8  ;;  %p792_p13 = pnand %p791_p12, %p944_p4  ;;  %p799_p3 = por %p798_p2, %p797_p1 }
  0x23   : > { %775 = vrot.lane.b32.xlu0 %v774_v5, %s870_s9  ;;  %785 = vrot.lane.b32.xlu1 %v774_v5, %s871_s10  ;;  %s1032_s10 = scalar_lea.hbm %s1083_s4, %s686_s5  ;;  %p793_p0 = pneg %p792_p13 }
  0x24   : > { %668 = vmatmul.mubr.msk.f32.vlgmr.msra.gmra.mrb[0].mxu1 %vm281_vm3, %v665_v9 }
  0x25   : > { %p800_p5 = pnand %p799_p3, %p793_p0 }
  0x27   : > { %549 = vperm.xlu0 %789, %v546_v10  }
  0x91   : > { %v771_v17 = vpop.permute.xlu0 %770  ;;  %v781_v18 = vpop.permute.xlu1 %780 }
  0x92   : > { %v773_v20 = vunpack.i.h.bf16 %v771_v17  ;;  %v772_v21 = vunpack.i.l.bf16 %v771_v17  ;;  %v783_v22 = vunpack.i.h.bf16 %v781_v18  ;;  %v782_v23 = vunpack.i.l.bf16 %v781_v18 }
  0x94   : > { %v455_v25 = vsel %vm451_vm4, %v783_v22, %v782_v23  ;;  %v269_v26 = vsel %vm267_vm5, %v772_v21, %v773_v20  ;;  %v271_v28 = vsel %vm267_vm5, %v773_v20, %v772_v21  ;;  %v453_v29 = vsel %vm451_vm4, %v782_v23, %v783_v22 }
  0x95   : > { %v776_v30 = vpop.permute.xlu0 %775  ;;  %v786_v31 = vpop.permute.xlu1 %785  ;;  %v461_v33 = vsel %vm974_vm6, %v455_v25, 0.0  ;;  %v277_v38 = vsel %vm984_vm8, %v269_v26, 0.0  ;;  %v276_v39 = vsel %vm978_vm7, %v271_v28, 0.0  ;;  %v460_v43 = vsel %vm990_vm9, %v453_v29, 0.0 }
  0x96   : > { %v778_v34 = vunpack.i.h.bf16 %v776_v30  ;;  %v777_v35 = vunpack.i.l.bf16 %v776_v30  ;;  %v788_v36 = vunpack.i.h.bf16 %v786_v31  ;;  %v787_v37 = vunpack.i.l.bf16 %v786_v31 }
  0x98   : > { %v454_v40 = vsel %vm451_vm4, %v788_v36, %v787_v37  ;;  %v268_v41 = vsel %vm267_vm5, %v777_v35, %v778_v34  ;;  %v270_v42 = vsel %vm267_vm5, %v778_v34, %v777_v35  ;;  %v452_v44 = vsel %vm451_vm4, %v787_v37, %v788_v36 }
  0x99   : > { %v693_v45 = vpack.c.bf16 %v277_v38, %v268_v41  ;;  %v696_v46 = vpack.c.bf16 %v276_v39, %v270_v42  ;;  %v699_v47 = vpack.c.bf16 %v461_v33, %v454_v40  ;;  %v702_v48 = vpack.c.bf16 %v460_v43, %v452_v44 }
  0x9b   : > { %695 = vmatprep.subr.msk.bf16.mxu0 %vm694_vm10, %v693_v45 }
  0x9c   : > { %698 = vmatpush1.bf16.msk.msra.mxu0 %vm697_vm11, %v696_v46 }
  0x9d   : > { %701 = vmatprep.subr.msk.bf16.mxu0 %vm700_vm12, %v699_v47 }
  0x9f   : > { %673 = vmatmul.mubr.msk.f32.vlgmr.msra.gmra.mrb[0].mxu0 %vm281_vm3, %v278_v49 }
  0xa0   : > { %704 = vmatpush1.bf16.msk.msra.mxu0 %vm703_vm13, %v702_v48  ;;  %537 = vmatprep.mubr.f32.mxu0 %v872_v6 }
  0xa6   : > { %v550_v54 = vpop.permute.xlu0 %549 }
  0xa7   : > { %679 = vmatmul.mubr.msk.f32.vlgmr.msra.gmra.mrb[0].mxu0 %vm281_vm3, %v674_v50 }
  0xf7   : > { %v358_v51 = vpop.f32.mrb[0].mxu1 }
  0xf8   : > { %v360_v52 = vpop.f32.mrb[1].mxu1 }
 0x17a   : > { %v539_v53 = vpop.f32.mrb[0].mxu0 }
 0x17b   : > { %v705_v55 = vadd.f32 %v539_v53, %v358_v51  ;;  %v541_v56 = vpop.f32.mrb[1].mxu0 }
 0x17c   : > { %v706_v57 = vadd.f32 %v541_v56, %v360_v52 }
 0x17d   : > { %v552_v59 = vadd.f32 %v705_v55, %v550_v54 }
 0x17e   : > { %v553_v60 = vadd.f32 %v706_v57, %v550_v54 }
 0x17f   : > { %vm555_vm14 = vcmp.ge.f32.partialorder %v552_v59, 0.0  ;;  %v558_v61 = vmul.f32 %v557_v58, %v552_v59 }
 0x180   : > { %vm556_vm15 = vcmp.ge.f32.partialorder %v553_v60, 0.0  ;;  %v559_v62 = vmul.f32 %v557_v58, %v553_v60 }
 0x181   : > { %v560_v63 = vsel %vm555_vm14, %v552_v59, %v558_v61 }
 0x182   : > { %v561_v0 = vsel %vm556_vm15, %v553_v60, %v559_v62  ;;  %562 = vst [vmem:[%s216_s6] sm:$0xff] %v560_v63 }
 0x183   : > { %563 = vst [vmem:[%s216_s6 + $0x8] sm:$0xff] %v561_v0 }
 0x184   : > { %803 = shalt.err (!%p800_p5)
}
 0x185   : > { %s804_s15 = scalar_lea.hbm %s1032_s10, 256  ;;  %s808_s23 = scalar_lea.hbm %s1083_s4, 512 }
 0x186   : > { %p805_p6 = scmp.ne.s32.totalorder %s1032_s10, %s804_s15  ;;  %p809_p10 = scmp.lt.u32.totalorder %s1032_s10, %s1083_s4 }
 0x187   : > { %p810_p11 = scmp.lt.u32.totalorder %s808_s23, %s804_s15  ;;  %p812_p13 = scmp.lt.u32.totalorder %s804_s15, %s1032_s10 }
 0x188   : > { %p806_p7 = pnand %p805_p6, %p944_p4 }
 0x189   : > { %p811_p12 = por %p810_p11, %p809_p10 }
 0x18a   : > { %p807_p9 = pneg %p806_p7 }
 0x18b   : > { %p813_p0 = por %p812_p13, %p811_p12 }
 0x18d   : > { %p814_p1 = pnand %p813_p0, %p807_p9 }
 0x18f   : > { %817 = shalt.err (!%p814_p1)
}
 0x190   : > { %709 = dma.vmem_to_hbm [thread:$0]  (%p944_p4), %s1034_s7, 256, %s1032_s10, %s565_s20  }
 0x191 PF: > { %p715_p2 = scmp.ge.s32.totalorder %s868_s22, 2  ;;  %s593_s30 = sand.u32 1, %s848_s17  }
 0x192   : > { %s594_s5 = scalar_lea.sflag [#allocation4], %s593_s30 }
 0x193   : > { %p712_p3 = pnand %p715_p2, %p951_p8 }
 0x195   : > { %843 = dma.done.wait (!%p712_p3), %s594_s5, 256  }
 0x196   : > { %845 = vsyncadd (!%p712_p3), %s594_s5, 4294967040  ;;  %s18_s22 = sadd.s32 1, %s868_s22   ;;  %s1094_s17 = smov %s852_s18 }
 0x197   : > { %p15_p5 = scmp.ge.s32.totalorder %s18_s22, 4   ;;  %s1095_s18 = smov %s856_s19 }
 0x198   : > { %s1096_s19 = smov %s957_s29  ;;  %s1097_s20 = smov %s864_s21 }
 0x199   : > { %s1098_s21 = smov %s1100_s24  ;;  %17 = sbr.rel (!%p15_p5) target bundleno = 6 (0x6), region = 73 }
 0x1a0   :  { %599 = vsyncpa [#allocation4], 1 }
 0x1a1   :  { %601 = vsyncpa [#allocation4 + $0x1], 1 }

</bundles_post_ra>
